<compile_context>
chip_gen: v7x
topology: tpu7x:2x2x1
jax: 0.10.0
libtpu: 0.0.40
codegen_flags: <defaults>
</compile_context>

<pallas_src>
import jax
import jax.numpy as jnp
from jax.experimental import pallas as pl
from jax.experimental.pallas import tpu as pltpu

NUM_LAYERS = 2   # number of (f, g) residual pairs
DIM = 128        # model dim (lane-aligned)
BATCH = 2
SEQ = 64


def _make_kernel(num_layers):
    def kernel(x_ref, w_ref, b_ref, o_ref):
        """All 2*L residual sublayers in one grid step.

        x_ref : (bm, D)         activation tile (input dtype)
        w_ref : (L, 2, D, D)    bf16 weight stack (in, out layout), VMEM resident
        b_ref : (L, 2, 1, D)    f32 biases, VMEM resident
        o_ref : (bm, D)         output tile
        """
        h = x_ref[...].astype(jnp.float32)
        # Static unroll over the (small) layer stack: activation stays in
        # vregs across all matmuls; no VMEM round trips between f and g.
        for l in range(num_layers):
            for j in range(2):
                # x = x + lin(x): f32 residual carry; bf16 MXU inputs,
                # f32 accumulation.
                h = h + (jnp.dot(h.astype(jnp.bfloat16), w_ref[l, j],
                                 preferred_element_type=jnp.float32)
                         + b_ref[l, j])
        o_ref[...] = h.astype(o_ref.dtype)
    return kernel


def sequential_forward(x, weights, biases, *, bm=None, vmem_limit_bytes=None):
    """x: (batch, seq, dim)
    weights: (L, 2, D, D) stored (in, out)  [transposed from nn.Linear's (out, in)]
    biases : (L, 2, 1, D)

    bm: rows per tile.  Default = all rows (one tile): on 1-TC v5e/v6e never
    split rows; on v7x pass bm = (batch*seq)//2 at real sizes so both
    TensorCores get one large tile each.
    """
    b, s, d = x.shape
    num_layers = weights.shape[0]
    m = b * s
    x2 = x.reshape(m, d)

    if bm is None:
        bm = m
    bm = min(bm, m)
    assert m % bm == 0 and bm % 8 == 0 and d % 128 == 0, "tile alignment"

    w_bf16 = weights.astype(jnp.bfloat16)                       # MXU input dtype
    b_f32 = biases.reshape(num_layers, 2, 1, d).astype(jnp.float32)

    out = pl.pallas_call(
        _make_kernel(num_layers),
        out_shape=jax.ShapeDtypeStruct((m, d), x.dtype),
        grid=(m // bm,),
        in_specs=[
            pl.BlockSpec((bm, d), lambda i: (i, 0)),                      # activations
            pl.BlockSpec((num_layers, 2, d, d), lambda i: (0, 0, 0, 0)),  # full weight stack
            pl.BlockSpec((num_layers, 2, 1, d), lambda i: (0, 0, 0, 0)),  # biases
        ],
        out_specs=pl.BlockSpec((bm, d), lambda i: (i, 0)),
        compiler_params=pltpu.CompilerParams(
            dimension_semantics=("parallel",),
            vmem_limit_bytes=vmem_limit_bytes),
    )(x2, w_bf16, b_f32)
    return out.reshape(b, s, d)


def _reference_mixed(x, weights, biases):
    """Mirror of the kernel's numerics (f32 residual, bf16 dot inputs, f32 accum)."""
    b, s, d = x.shape
    num_layers = weights.shape[0]
    wb = weights.astype(jnp.bfloat16)
    bf = biases.reshape(num_layers, 2, 1, d).astype(jnp.float32)
    h = x.reshape(b * s, d).astype(jnp.float32)
    for l in range(num_layers):
        for j in range(2):
            h = h + (jnp.dot(h.astype(jnp.bfloat16), wb[l, j],
                             preferred_element_type=jnp.float32) + bf[l, j])
    return h.reshape(b, s, d)


def _reference_f32(x, weights, biases):
    """True module semantics: full f32 Linear + residual."""
    b, s, d = x.shape
    num_layers = weights.shape[0]
    bf = biases.reshape(num_layers, 2, 1, d).astype(jnp.float32)
    h = x.reshape(b * s, d).astype(jnp.float32)
    for l in range(num_layers):
        for j in range(2):
            h = h + (jnp.dot(h, weights[l, j].astype(jnp.float32),
                             precision=jax.lax.Precision.HIGHEST) + bf[l, j])
    return h.reshape(b, s, d)


if __name__ == "__main__":
    key = jax.random.PRNGKey(0)
    kx, kw, kb = jax.random.split(key, 3)

    x = jax.random.normal(kx, (BATCH, SEQ, DIM), dtype=jnp.float32)
    # deterministic synthetic Linear parameters (fan-in scaled)
    weights = jax.random.normal(
        kw, (NUM_LAYERS, 2, DIM, DIM), dtype=jnp.float32) / jnp.sqrt(DIM)
    biases = jax.random.normal(
        kb, (NUM_LAYERS, 2, 1, DIM), dtype=jnp.float32) * 0.01

    # Default bm = all rows: single grid step, no row splitting (1-TC chips);
    # on v7x at real sizes pass bm=(BATCH*SEQ)//2 for one tile per TensorCore.
    out = sequential_forward(x, weights, biases)
    out = jax.block_until_ready(out)
    assert out.shape == (BATCH, SEQ, DIM)

    # Tight check: kernel vs an identical-recipe reference (validates the kernel).
    ref_mixed = _reference_mixed(x, weights, biases)
    assert jnp.allclose(out, ref_mixed, atol=2e-3, rtol=2e-3), "mismatch vs mixed-precision reference"

    # Loose check: kernel vs the true f32 module semantics (quantifies bf16-MXU drift).
    ref_f32 = _reference_f32(x, weights, biases)
    max_drift = float(jnp.max(jnp.abs(out - ref_f32)))
    assert jnp.allclose(out, ref_f32, atol=2e-1, rtol=5e-2), (
        f"excessive drift vs f32 reference: {max_drift}")

    print("KERNEL_OK")
</pallas_src>

<mosaic_0001>
module attributes {stable_mosaic.version = 11 : i64} {
  func.func @kernel(%arg0: i32, %arg1: memref<128x128xf32, #tpu.memory_space<vmem>>, %arg2: memref<2x2x128x128xbf16, #tpu.memory_space<vmem>>, %arg3: memref<2x2x1x128xf32, #tpu.memory_space<vmem>>, %arg4: memref<128x128xf32, #tpu.memory_space<vmem>>) attributes {dimension_semantics = [#tpu.dimension_semantics<parallel>], iteration_bounds = array<i64: 1>, scalar_prefetch = 0 : i64, scratch_operands = 0 : i64, tpu.core_type = #tpu.core_type<tc>, window_params = [{transform_indices = @transform_0, window_bounds = array<i64: 128, 128>}, {pipeline_mode = #tpu.pipeline_mode<synchronous>, transform_indices = @transform_1, window_bounds = array<i64: 2, 2, 128, 128>}, {pipeline_mode = #tpu.pipeline_mode<synchronous>, transform_indices = @transform_2, window_bounds = array<i64: 2, 2, 1, 128>}, {transform_indices = @transform_3, window_bounds = array<i64: 128, 128>}]} {
    %c0 = arith.constant 0 : index
    %c0_0 = arith.constant 0 : index
    %0 = vector.load %arg1[%c0, %c0_0] : memref<128x128xf32, #tpu.memory_space<vmem>>, vector<128x128xf32>
    %1 = arith.truncf %0 : vector<128x128xf32> to vector<128x128xbf16>
    %c0_1 = arith.constant 0 : index
    %c0_2 = arith.constant 0 : index
    %c0_3 = arith.constant 0 : index
    %c0_4 = arith.constant 0 : index
    %2 = vector.load %arg2[%c0_1, %c0_2, %c0_3, %c0_4] : memref<2x2x128x128xbf16, #tpu.memory_space<vmem>>, vector<1x1x128x128xbf16>
    %3 = vector.shape_cast %2 : vector<1x1x128x128xbf16> to vector<128x128xbf16>
    %cst = arith.constant dense<0.000000e+00> : vector<128x128xf32>
    %4 = tpu.matmul %1, %3, %cst {dimension_numbers = #tpu.dot_dimension_numbers<[1], [0], [0], [1], [0, 0, 1, 1], [], []>} : vector<128x128xbf16>, vector<128x128xbf16>, vector<128x128xf32> -> vector<128x128xf32>
    %c0_5 = arith.constant 0 : index
    %c0_6 = arith.constant 0 : index
    %c0_7 = arith.constant 0 : index
    %c0_8 = arith.constant 0 : index
    %5 = vector.load %arg3[%c0_5, %c0_6, %c0_7, %c0_8] : memref<2x2x1x128xf32, #tpu.memory_space<vmem>>, vector<1x1x1x128xf32>
    %6 = vector.shape_cast %5 : vector<1x1x1x128xf32> to vector<1x128xf32>
    %7 = vector.broadcast %6 : vector<1x128xf32> to vector<128x128xf32>
    %8 = arith.addf %4, %7 : vector<128x128xf32>
    %9 = arith.addf %0, %8 : vector<128x128xf32>
    %10 = arith.truncf %9 : vector<128x128xf32> to vector<128x128xbf16>
    %c0_9 = arith.constant 0 : index
    %c1 = arith.constant 1 : index
    %c0_10 = arith.constant 0 : index
    %c0_11 = arith.constant 0 : index
    %11 = vector.load %arg2[%c0_9, %c1, %c0_10, %c0_11] : memref<2x2x128x128xbf16, #tpu.memory_space<vmem>>, vector<1x1x128x128xbf16>
    %12 = vector.shape_cast %11 : vector<1x1x128x128xbf16> to vector<128x128xbf16>
    %cst_12 = arith.constant dense<0.000000e+00> : vector<128x128xf32>
    %13 = tpu.matmul %10, %12, %cst_12 {dimension_numbers = #tpu.dot_dimension_numbers<[1], [0], [0], [1], [0, 0, 1, 1], [], []>} : vector<128x128xbf16>, vector<128x128xbf16>, vector<128x128xf32> -> vector<128x128xf32>
    %c0_13 = arith.constant 0 : index
    %c1_14 = arith.constant 1 : index
    %c0_15 = arith.constant 0 : index
    %c0_16 = arith.constant 0 : index
    %14 = vector.load %arg3[%c0_13, %c1_14, %c0_15, %c0_16] : memref<2x2x1x128xf32, #tpu.memory_space<vmem>>, vector<1x1x1x128xf32>
    %15 = vector.shape_cast %14 : vector<1x1x1x128xf32> to vector<1x128xf32>
    %16 = vector.broadcast %15 : vector<1x128xf32> to vector<128x128xf32>
    %17 = arith.addf %13, %16 : vector<128x128xf32>
    %18 = arith.addf %9, %17 : vector<128x128xf32>
    %19 = arith.truncf %18 : vector<128x128xf32> to vector<128x128xbf16>
    %c1_17 = arith.constant 1 : index
    %c0_18 = arith.constant 0 : index
    %c0_19 = arith.constant 0 : index
    %c0_20 = arith.constant 0 : index
    %20 = vector.load %arg2[%c1_17, %c0_18, %c0_19, %c0_20] : memref<2x2x128x128xbf16, #tpu.memory_space<vmem>>, vector<1x1x128x128xbf16>
    %21 = vector.shape_cast %20 : vector<1x1x128x128xbf16> to vector<128x128xbf16>
    %cst_21 = arith.constant dense<0.000000e+00> : vector<128x128xf32>
    %22 = tpu.matmul %19, %21, %cst_21 {dimension_numbers = #tpu.dot_dimension_numbers<[1], [0], [0], [1], [0, 0, 1, 1], [], []>} : vector<128x128xbf16>, vector<128x128xbf16>, vector<128x128xf32> -> vector<128x128xf32>
    %c1_22 = arith.constant 1 : index
    %c0_23 = arith.constant 0 : index
    %c0_24 = arith.constant 0 : index
    %c0_25 = arith.constant 0 : index
    %23 = vector.load %arg3[%c1_22, %c0_23, %c0_24, %c0_25] : memref<2x2x1x128xf32, #tpu.memory_space<vmem>>, vector<1x1x1x128xf32>
    %24 = vector.shape_cast %23 : vector<1x1x1x128xf32> to vector<1x128xf32>
    %25 = vector.broadcast %24 : vector<1x128xf32> to vector<128x128xf32>
    %26 = arith.addf %22, %25 : vector<128x128xf32>
    %27 = arith.addf %18, %26 : vector<128x128xf32>
    %28 = arith.truncf %27 : vector<128x128xf32> to vector<128x128xbf16>
    %c1_26 = arith.constant 1 : index
    %c1_27 = arith.constant 1 : index
    %c0_28 = arith.constant 0 : index
    %c0_29 = arith.constant 0 : index
    %29 = vector.load %arg2[%c1_26, %c1_27, %c0_28, %c0_29] : memref<2x2x128x128xbf16, #tpu.memory_space<vmem>>, vector<1x1x128x128xbf16>
    %30 = vector.shape_cast %29 : vector<1x1x128x128xbf16> to vector<128x128xbf16>
    %cst_30 = arith.constant dense<0.000000e+00> : vector<128x128xf32>
    %31 = tpu.matmul %28, %30, %cst_30 {dimension_numbers = #tpu.dot_dimension_numbers<[1], [0], [0], [1], [0, 0, 1, 1], [], []>} : vector<128x128xbf16>, vector<128x128xbf16>, vector<128x128xf32> -> vector<128x128xf32>
    %c1_31 = arith.constant 1 : index
    %c1_32 = arith.constant 1 : index
    %c0_33 = arith.constant 0 : index
    %c0_34 = arith.constant 0 : index
    %32 = vector.load %arg3[%c1_31, %c1_32, %c0_33, %c0_34] : memref<2x2x1x128xf32, #tpu.memory_space<vmem>>, vector<1x1x1x128xf32>
    %33 = vector.shape_cast %32 : vector<1x1x1x128xf32> to vector<1x128xf32>
    %34 = vector.broadcast %33 : vector<1x128xf32> to vector<128x128xf32>
    %35 = arith.addf %31, %34 : vector<128x128xf32>
    %36 = arith.addf %27, %35 : vector<128x128xf32>
    %c0_35 = arith.constant 0 : index
    %c0_36 = arith.constant 0 : index
    %37 = vector.load %arg4[%c0_35, %c0_36] : memref<128x128xf32, #tpu.memory_space<vmem>>, vector<128x128xf32>
    tpu.vector_store %arg4[%c0_35, %c0_36], %36 {strides = array<i32>} : memref<128x128xf32, #tpu.memory_space<vmem>>, vector<128x128xf32>,
    return
  }
  func.func @transform_0(%arg0: i32) -> (i32, i32) {
    %c0_i32 = arith.constant 0 : i32
    %c0_i32_0 = arith.constant 0 : i32
    return %arg0, %c0_i32 : i32, i32
  }
  func.func @transform_1(%arg0: i32) -> (i32, i32, i32, i32) {
    %c0_i32 = arith.constant 0 : i32
    %c0_i32_0 = arith.constant 0 : i32
    %c0_i32_1 = arith.constant 0 : i32
    %c0_i32_2 = arith.constant 0 : i32
    %c0_i32_3 = arith.constant 0 : i32
    return %c0_i32, %c0_i32_0, %c0_i32_1, %c0_i32_2 : i32, i32, i32, i32
  }
  func.func @transform_2(%arg0: i32) -> (i32, i32, i32, i32) {
    %c0_i32 = arith.constant 0 : i32
    %c0_i32_0 = arith.constant 0 : i32
    %c0_i32_1 = arith.constant 0 : i32
    %c0_i32_2 = arith.constant 0 : i32
    %c0_i32_3 = arith.constant 0 : i32
    return %c0_i32, %c0_i32_0, %c0_i32_1, %c0_i32_2 : i32, i32, i32, i32
  }
  func.func @transform_3(%arg0: i32) -> (i32, i32) {
    %c0_i32 = arith.constant 0 : i32
    %c0_i32_0 = arith.constant 0 : i32
    return %arg0, %c0_i32 : i32, i32
  }
}

</mosaic_0001>

<bundles_post_ra>
// kernel: tpu_custom_call.1
= control target key start
LH: loop header
LB: loop body
LE: loop exit
PB: predicated region body
PF: predicated region fallthrough
CT: control target
= control target key end

     0   :  { %8 = vsyncpa [#allocation3], 0  ;;  %s1531_s0 = inlined_call_operand.hbm [shape: f32[128,128], index: 0, kind: input, shape index: {}]   ;;  %s1532_s1 = inlined_call_operand.hbm [shape: bf16[2,2,128,128], index: 1, kind: input, shape index: {}]   ;;  %s1533_s2 = inlined_call_operand.vmem [shape: f32[2,2,1,128], index: 2, kind: input, shape index: {}]   ;;  %s1534_s3 = inlined_call_operand.hbm [shape: f32[128,128], index: 3, kind: output, shape index: {}]  }
   0x1   :  { %9 = vsyncpa [#allocation6], 0 }
   0x2   :  { %10 = vsyncpa [#allocation4], 0  ;;  %s1210_s12 = smov [#allocation2]   ;;  %s1138_s16 = scalar_lea.hbm %s1531_s0, 2048 }
   0x3   :  { %s16_s13 = sshll.u32 %s1210_s12, 4  ;;  %p1139_p0 = scmp.ne.s32.totalorder %s1531_s0, %s1138_s16  ;;  %s17_s13 = int_to_ptr.vmem [resolvable:$true] %s16_s13 }
   0x4   :  { %p1142_p1 = scmp.lt.u32.totalorder %s1138_s16, %s1531_s0 }
   0x6   :  { %p1144_p2 = pnand %p1142_p1, %p1139_p0 }
   0x8   :  { %1147 = shalt.err (!%p1144_p2)
}
   0x9   :  { %s1148_s21 = scalar_lea.vmem %s17_s13, 2048  ;;  %p1153_p4 = scmp.lt.s32.totalorder %s17_s13, %s17_s13 }
   0xa   :  { %p1149_p3 = scmp.ne.s32.totalorder %s17_s13, %s1148_s21  ;;  %p1154_p5 = scmp.lt.s32.totalorder %s1148_s21, %s1148_s21 }
   0xc   :  { %p1155_p6 = por %p1154_p5, %p1153_p4 }
   0xe   :  { %p1156_p7 = pnand %p1155_p6, %p1149_p3 }
  0x10   :  { %1159 = shalt.err (!%p1156_p7)
}
  0x11   :  { %s1211_s22 = smov 128   ;;  %s1212_s23 = smov 8  }
  0x12   :  { %22 = dma.hbm_to_vmem [thread:$0]  %s1531_s0, 2048, %s17_s13, [#allocation3], %s1211_s22, %s1211_s22, %s1212_s23  }
  0x13   :  { %s1213_s26 = smov [#allocation5]   ;;  %s1160_s30 = scalar_lea.hbm %s1532_s1, 4096 }
  0x14   :  { %s28_s27 = sshll.u32 %s1213_s26, 4  ;;  %p1161_p8 = scmp.ne.s32.totalorder %s1532_s1, %s1160_s30  ;;  %s29_s27 = int_to_ptr.vmem [resolvable:$true] %s28_s27 }
  0x15   :  { %p1164_p9 = scmp.lt.u32.totalorder %s1160_s30, %s1532_s1 }
  0x17   :  { %p1166_p10 = pnand %p1164_p9, %p1161_p8 }
  0x19   :  { %1169 = shalt.err (!%p1166_p10)
}
  0x1a   :  { %s1170_s8 = scalar_lea.vmem %s29_s27, 4096  ;;  %p1175_p12 = scmp.lt.s32.totalorder %s29_s27, %s29_s27 }
  0x1b   :  { %p1171_p11 = scmp.ne.s32.totalorder %s29_s27, %s1170_s8  ;;  %p1176_p13 = scmp.lt.s32.totalorder %s1170_s8, %s1170_s8 }
  0x1d   :  { %p1177_p0 = por %p1176_p13, %p1175_p12 }
  0x1f   :  { %p1178_p1 = pnand %p1177_p0, %p1171_p11 }
  0x21   :  { %1181 = shalt.err (!%p1178_p1)
}
  0x22   :  { %s1214_s0 = smov 64   ;;  %s1215_s9 = smov 4  }
  0x23   :  { %34 = dma.hbm_to_vmem [thread:$0]  %s1532_s1, 4096, %s29_s27, [#allocation6], %s1214_s0, %s1214_s0, %s1215_s9  }
  0x24   :  { %1204 = dma.done.wait [#allocation3], 2048  }
  0x25   :  { %1205 = vsyncadd [#allocation3], 4294965248 }
  0x26   :  { %1206 = dma.done.wait [#allocation6], 4096  }
  0x27   :  { %1207 = vsyncadd [#allocation6], 4294963200  ;;  %v1106_v0 = vld [vmem:[#allocation5] sm:$0xff]   ;;  %v1107_v1 = vld [vmem:[#allocation5 + $0x8] sm:$0xff]  }
  0x28   :  { %971 = vmatprep.subr.bf16.mxu0 %v1106_v0  ;;  %v1108_v2 = vld [vmem:[#allocation5 + $0x10] sm:$0xff]   ;;  %v1109_v3 = vld [vmem:[#allocation5 + $0x18] sm:$0xff]   ;;  %v1264_v4 = vld [vmem:[#allocation2] sm:$0xff] }
  0x29   :  { %972 = vmatpush3.bf16.msra.mxu0 %v1106_v0  ;;  %v1266_v5 = vld [vmem:[#allocation2 + $0x8] sm:$0xff]  ;;  %v1110_v7 = vld [vmem:[#allocation5 + $0x20] sm:$0xff]   ;;  %v1116_v11 = vld [vmem:[#allocation5 + $0x50] sm:$0xff]  }
  0x2a   :  { %973 = vmatprep.subr.bf16.mxu0 %v1107_v1  ;;  %v60_v6 = vpack.c.bf16 %v1266_v5, %v1264_v4  ;;  %v1114_v8 = vld [vmem:[#allocation5 + $0x40] sm:$0xff]   ;;  %v1115_v9 = vld [vmem:[#allocation5 + $0x48] sm:$0xff]   ;;  %v1112_v12 = vld [vmem:[#allocation5 + $0x30] sm:$0xff]  }
  0x2b   :  { %v1111_v10 = vld [vmem:[#allocation5 + $0x28] sm:$0xff]   ;;  %1003 = vmatprep.subr.bf16.mxu1 %v1114_v8  ;;  %v1117_v13 = vld [vmem:[#allocation5 + $0x58] sm:$0xff]   ;;  %v1118_v15 = vld [vmem:[#allocation5 + $0x60] sm:$0xff]  }
  0x2c   :  { %987 = vmatprep.mubr.bf16.mxu0 %v60_v6  ;;  %1004 = vmatpush3.bf16.msra.mxu1 %v1114_v8  ;;  %v1113_v14 = vld [vmem:[#allocation5 + $0x38] sm:$0xff]   ;;  %v1270_v16 = vld [vmem:[#allocation2 + $0x10] sm:$0xff]  ;;  %v1274_v18 = vld [vmem:[#allocation2 + $0x20] sm:$0xff] }
  0x2d   :  { %974 = vmatpush3.bf16.msra.mxu0 %v1107_v1  ;;  %1005 = vmatprep.subr.bf16.mxu1 %v1115_v9  ;;  %v1272_v17 = vld [vmem:[#allocation2 + $0x18] sm:$0xff]  ;;  %v1276_v19 = vld [vmem:[#allocation2 + $0x28] sm:$0xff]  ;;  %v1282_v23 = vld [vmem:[#allocation2 + $0x30] sm:$0xff] }
  0x2e   :  { %975 = vmatprep.subr.bf16.mxu0 %v1108_v2  ;;  %v1119_v20 = vld [vmem:[#allocation5 + $0x68] sm:$0xff]   ;;  %v61_v21 = vpack.c.bf16 %v1272_v17, %v1270_v16  ;;  %v62_v22 = vpack.c.bf16 %v1276_v19, %v1274_v18  ;;  %v1284_v24 = vld [vmem:[#allocation2 + $0x38] sm:$0xff]  ;;  %v1286_v25 = vld [vmem:[#allocation2 + $0x40] sm:$0xff] }
  0x2f   :  { %v1288_v26 = vld [vmem:[#allocation2 + $0x48] sm:$0xff]  ;;  %v63_v27 = vpack.c.bf16 %v1284_v24, %v1282_v23  ;;  %v1294_v29 = vld [vmem:[#allocation2 + $0x50] sm:$0xff]  ;;  %v1296_v30 = vld [vmem:[#allocation2 + $0x58] sm:$0xff] }
  0x30   :  { %1006 = vmatpush3.bf16.msra.mxu1 %v1115_v9  ;;  %v64_v28 = vpack.c.bf16 %v1288_v26, %v1286_v25  ;;  %v1298_v31 = vld [vmem:[#allocation2 + $0x60] sm:$0xff]  ;;  %v1300_v32 = vld [vmem:[#allocation2 + $0x68] sm:$0xff]  ;;  %v65_v33 = vpack.c.bf16 %v1296_v30, %v1294_v29  ;;  %v1306_v35 = vld [vmem:[#allocation2 + $0x70] sm:$0xff] }
  0x31   :  { %976 = vmatpush3.bf16.msra.mxu0 %v1108_v2  ;;  %1007 = vmatprep.subr.bf16.mxu1 %v1116_v11  ;;  %v66_v34 = vpack.c.bf16 %v1300_v32, %v1298_v31  ;;  %v1308_v36 = vld [vmem:[#allocation2 + $0x78] sm:$0xff]  ;;  %v1120_v38 = vld [vmem:[#allocation5 + $0x70] sm:$0xff]   ;;  %v1122_v40 = vld [vmem:[#allocation5 + $0x80] sm:$0xff]  }
  0x32   :  { %977 = vmatprep.subr.bf16.mxu0 %v1109_v3  ;;  %v67_v37 = vpack.c.bf16 %v1308_v36, %v1306_v35  ;;  %v1121_v39 = vld [vmem:[#allocation5 + $0x78] sm:$0xff]   ;;  %v1123_v41 = vld [vmem:[#allocation5 + $0x88] sm:$0xff]   ;;  %v1124_v42 = vld [vmem:[#allocation5 + $0x90] sm:$0xff]  }
  0x33   :  { %v1125_v43 = vld [vmem:[#allocation5 + $0x98] sm:$0xff]   ;;  %v1126_v44 = vld [vmem:[#allocation5 + $0xa0] sm:$0xff]   ;;  %v1127_v45 = vld [vmem:[#allocation5 + $0xa8] sm:$0xff]  }
  0x34   :  { %1008 = vmatpush3.bf16.msra.mxu1 %v1116_v11  ;;  %v868_v46 = vld [vmem:[%s1533_s2] ss:$0 sm:$0xff] }
  0x35   :  { %978 = vmatpush3.bf16.msra.mxu0 %v1109_v3  ;;  %1009 = vmatprep.subr.bf16.mxu1 %v1117_v13 }
  0x36   :  { %979 = vmatprep.subr.bf16.mxu0 %v1110_v7 }
  0x38   :  { %1010 = vmatpush3.bf16.msra.mxu1 %v1117_v13 }
  0x39   :  { %980 = vmatpush3.bf16.msra.mxu0 %v1110_v7  ;;  %1011 = vmatprep.subr.bf16.mxu1 %v1118_v15 }
  0x3a   :  { %981 = vmatprep.subr.bf16.mxu0 %v1111_v10 }
  0x3c   :  { %1012 = vmatpush3.bf16.msra.mxu1 %v1118_v15 }
  0x3d   :  { %982 = vmatpush3.bf16.msra.mxu0 %v1111_v10  ;;  %1013 = vmatprep.subr.bf16.mxu1 %v1119_v20 }
  0x3e   :  { %983 = vmatprep.subr.bf16.mxu0 %v1112_v12 }
  0x40   :  { %1014 = vmatpush3.bf16.msra.mxu1 %v1119_v20 }
  0x41   :  { %984 = vmatpush3.bf16.msra.mxu0 %v1112_v12  ;;  %1015 = vmatprep.subr.bf16.mxu1 %v1120_v38 }
  0x42   :  { %985 = vmatprep.subr.bf16.mxu0 %v1113_v14 }
  0x44   :  { %1016 = vmatpush3.bf16.msra.mxu1 %v1120_v38 }
  0x45   :  { %986 = vmatpush3.bf16.msra.mxu0 %v1113_v14  ;;  %1017 = vmatprep.subr.bf16.mxu1 %v1121_v39 }
  0x46   :  { %1035 = vmatprep.subr.bf16.mxu0 %v1122_v40 }
  0x48   :  { %988 = vmatmul.mubr.bf16.vlgmr.msra.gmra.mrb[0].mxu0 %v61_v21  ;;  %1018 = vmatpush3.bf16.msra.mxu1 %v1121_v39 }
  0x49   :  { %991 = vmatprep.mubr.bf16.mxu0 %v62_v22  ;;  %1036 = vmatpush3.bf16.msra.mxu0 %v1122_v40 }
  0x4a   :  { %1037 = vmatprep.subr.bf16.mxu0 %v1123_v41 }
  0x4d   :  { %1038 = vmatpush3.bf16.msra.mxu0 %v1123_v41 }
  0x4e   :  { %1039 = vmatprep.subr.bf16.mxu0 %v1124_v42 }
  0x50   :  { %992 = vmatmul.mubr.bf16.gmra.mrb[4].mxu0 %v63_v27 }
  0x51   :  { %995 = vmatprep.mubr.bf16.mxu0 %v64_v28  ;;  %1040 = vmatpush3.bf16.msra.mxu0 %v1124_v42 }
  0x52   :  { %1041 = vmatprep.subr.bf16.mxu0 %v1125_v43 }
  0x55   :  { %1042 = vmatpush3.bf16.msra.mxu0 %v1125_v43  ;;  %v1128_v43 = vld [vmem:[#allocation5 + $0xb0] sm:$0xff]  }
  0x56   :  { %1043 = vmatprep.subr.bf16.mxu0 %v1126_v44 }
  0x58   :  { %996 = vmatmul.mubr.bf16.gmra.mrb[8].mxu0 %v65_v33 }
  0x59   :  { %999 = vmatprep.mubr.bf16.mxu0 %v66_v34  ;;  %1044 = vmatpush3.bf16.msra.mxu0 %v1126_v44  ;;  %v1133_v44 = vld [vmem:[#allocation5 + $0xd8] sm:$0xff]  }
  0x5a   :  { %1045 = vmatprep.subr.bf16.mxu0 %v1127_v45 }
  0x5d   :  { %1046 = vmatpush3.bf16.msra.mxu0 %v1127_v45  ;;  %v1134_v45 = vld [vmem:[#allocation5 + $0xe0] sm:$0xff]  }
  0x5e   :  { %1047 = vmatprep.subr.bf16.mxu0 %v1128_v43 }
  0x60   :  { %1000 = vmatmul.mubr.bf16.gmra.mrb[12].mxu0 %v67_v37 }
  0x61   :  { %1048 = vmatpush3.bf16.msra.mxu0 %v1128_v43 }
 0x11b   :  { %v989_v47 = vpop.f32.mrb[0].mxu0 }
 0x11c   :  { %v173_v48 = vpop.f32.mrb[1].mxu0  ;;  %v182_v51 = vadd.f32 %v989_v47, %v868_v46  ;;  %v878_v47 = vld [vmem:[%s1533_s2 + $0x1] ss:$0 sm:$0xff] }
 0x11d   :  { %v174_v49 = vadd.f32 %v868_v46, %v173_v48  ;;  %v990_v50 = vpop.f32.mrb[2].mxu0 }
 0x11e   :  { %v185_v52 = vadd.f32 %v990_v50, %v868_v46  ;;  %v176_v53 = vpop.f32.mrb[3].mxu0  ;;  %v1325_v58 = vadd.f32 %v182_v51, %v1270_v16 }
 0x11f   :  { %v177_v54 = vadd.f32 %v868_v46, %v176_v53  ;;  %v1319_v56 = vadd.f32 %v174_v49, %v1264_v4 }
 0x120   :  { %v1316_v55 = vadd.f32 %v185_v52, %v1272_v17 }
 0x121   :  { %v1322_v57 = vadd.f32 %v177_v54, %v1266_v5 }
 0x122   :  { %v253_v62 = vpack.c.bf16 %v1316_v55, %v1325_v58 }
 0x123   :  { %v993_v59 = vpop.f32.mrb[4].mxu0  ;;  %v252_v60 = vpack.c.bf16 %v1322_v57, %v1319_v56 }
 0x124   :  { %v189_v61 = vpop.f32.mrb[5].mxu0  ;;  %v198_v1 = vadd.f32 %v993_v59, %v868_v46 }
 0x125   :  { %v190_v63 = vadd.f32 %v868_v46, %v189_v61  ;;  %v994_v0 = vpop.f32.mrb[6].mxu0  ;;  %1019 = vmatprep.mubr.bf16.mxu1 %v252_v60 }
 0x126   :  { %v201_v2 = vadd.f32 %v994_v0, %v868_v46  ;;  %v192_v3 = vpop.f32.mrb[7].mxu0  ;;  %1020 = vmatmul.mubr.bf16.vlgmr.msra.gmra.mrb[0].mxu1 %v253_v62  ;;  %v1341_v8 = vadd.f32 %v198_v1, %v1282_v23 }
 0x127   :  { %v193_v4 = vadd.f32 %v868_v46, %v192_v3  ;;  %v1335_v6 = vadd.f32 %v190_v63, %v1274_v18 }
 0x128   :  { %v1332_v5 = vadd.f32 %v201_v2, %v1284_v24 }
 0x129   :  { %v1338_v7 = vadd.f32 %v193_v4, %v1276_v19 }
 0x12a   :  { %v255_v12 = vpack.c.bf16 %v1332_v5, %v1341_v8 }
 0x12b   :  { %v997_v9 = vpop.f32.mrb[8].mxu0  ;;  %v254_v10 = vpack.c.bf16 %v1338_v7, %v1335_v6 }
 0x12c   :  { %v205_v11 = vpop.f32.mrb[9].mxu0  ;;  %v214_v15 = vadd.f32 %v997_v9, %v868_v46 }
 0x12d   :  { %v206_v13 = vadd.f32 %v868_v46, %v205_v11  ;;  %v998_v14 = vpop.f32.mrb[10].mxu0  ;;  %1023 = vmatprep.mubr.bf16.mxu1 %v254_v10 }
 0x12e   :  { %v217_v16 = vadd.f32 %v998_v14, %v868_v46  ;;  %v208_v17 = vpop.f32.mrb[11].mxu0  ;;  %1024 = vmatmul.mubr.bf16.gmra.mrb[4].mxu1 %v255_v12  ;;  %v1357_v22 = vadd.f32 %v214_v15, %v1294_v29 }
 0x12f   :  { %v209_v18 = vadd.f32 %v868_v46, %v208_v17  ;;  %v1351_v20 = vadd.f32 %v206_v13, %v1286_v25 }
 0x130   :  { %v1348_v19 = vadd.f32 %v217_v16, %v1296_v30 }
 0x131   :  { %v1354_v21 = vadd.f32 %v209_v18, %v1288_v26 }
 0x132   :  { %v257_v28 = vpack.c.bf16 %v1348_v19, %v1357_v22 }
 0x133   :  { %v1001_v23 = vpop.f32.mrb[12].mxu0  ;;  %v256_v24 = vpack.c.bf16 %v1354_v21, %v1351_v20 }
 0x134   :  { %v221_v27 = vpop.f32.mrb[13].mxu0  ;;  %v230_v34 = vadd.f32 %v1001_v23, %v868_v46 }
 0x135   :  { %v222_v33 = vadd.f32 %v868_v46, %v221_v27  ;;  %v1002_v30 = vpop.f32.mrb[14].mxu0  ;;  %1027 = vmatprep.mubr.bf16.mxu1 %v256_v24 }
 0x136   :  { %v233_v25 = vadd.f32 %v1002_v30, %v868_v46  ;;  %v224_v37 = vpop.f32.mrb[15].mxu0  ;;  %1028 = vmatmul.mubr.bf16.gmra.mrb[8].mxu1 %v257_v28  ;;  %v1373_v40 = vadd.f32 %v230_v34, %v1306_v35  ;;  %v1132_v35 = vld [vmem:[#allocation5 + $0xd0] sm:$0xff]  }
 0x137   :  { %v225_v26 = vadd.f32 %v868_v46, %v224_v37  ;;  %v1367_v29 = vadd.f32 %v222_v33, %v1298_v31  ;;  %v1130_v31 = vld [vmem:[#allocation5 + $0xc0] sm:$0xff]   ;;  %v1135_v46 = vld [vmem:[#allocation5 + $0xe8] sm:$0xff]  }
 0x138   :  { %v1364_v38 = vadd.f32 %v233_v25, %v1308_v36  ;;  %v1129_v36 = vld [vmem:[#allocation5 + $0xb8] sm:$0xff]   ;;  %1067 = vmatprep.subr.bf16.mxu1 %v1130_v31 }
 0x139   :  { %v1370_v39 = vadd.f32 %v225_v26, %v1300_v32  ;;  %1049 = vmatprep.subr.bf16.mxu0 %v1129_v36  ;;  %v1131_v32 = vld [vmem:[#allocation5 + $0xc8] sm:$0xff]   ;;  %1068 = vmatpush3.bf16.msra.mxu1 %v1130_v31 }
 0x13a   :  { %v259_v42 = vpack.c.bf16 %v1364_v38, %v1373_v40  ;;  %1050 = vmatpush3.bf16.msra.mxu0 %v1129_v36  ;;  %1069 = vmatprep.subr.bf16.mxu1 %v1131_v32 }
 0x13b   :  { %v258_v41 = vpack.c.bf16 %v1370_v39, %v1367_v29 }
 0x13d   :  { %1031 = vmatprep.mubr.bf16.mxu1 %v258_v41  ;;  %1070 = vmatpush3.bf16.msra.mxu1 %v1131_v32 }
 0x13e   :  { %1032 = vmatmul.mubr.bf16.gmra.mrb[12].mxu1 %v259_v42  ;;  %1071 = vmatprep.subr.bf16.mxu1 %v1132_v35 }
 0x141   :  { %1072 = vmatpush3.bf16.msra.mxu1 %v1132_v35 }
 0x142   :  { %1073 = vmatprep.subr.bf16.mxu1 %v1133_v44 }
 0x145   :  { %1074 = vmatpush3.bf16.msra.mxu1 %v1133_v44  ;;  %v1136_v44 = vld [vmem:[#allocation5 + $0xf0] sm:$0xff]  }
 0x146   :  { %1075 = vmatprep.subr.bf16.mxu1 %v1134_v45 }
 0x149   :  { %1076 = vmatpush3.bf16.msra.mxu1 %v1134_v45 }
 0x14a   :  { %1077 = vmatprep.subr.bf16.mxu1 %v1135_v46 }
 0x14d   :  { %1078 = vmatpush3.bf16.msra.mxu1 %v1135_v46 }
 0x14e   :  { %1079 = vmatprep.subr.bf16.mxu1 %v1136_v44 }
 0x151   :  { %1080 = vmatpush3.bf16.msra.mxu1 %v1136_v44 }
 0x1f9   :  { %v1021_v48 = vpop.f32.mrb[0].mxu1 }
 0x1fa   :  { %v367_v49 = vpop.f32.mrb[1].mxu1  ;;  %v376_v52 = vadd.f32 %v1021_v48, %v878_v47 }
 0x1fb   :  { %v368_v50 = vadd.f32 %v878_v47, %v367_v49  ;;  %v1022_v51 = vpop.f32.mrb[2].mxu1 }
 0x1fc   :  { %v379_v53 = vadd.f32 %v1022_v51, %v878_v47  ;;  %v370_v54 = vpop.f32.mrb[3].mxu1  ;;  %v1392_v63 = vadd.f32 %v376_v52, %v1325_v58 }
 0x1fd   :  { %v371_v59 = vadd.f32 %v878_v47, %v370_v54  ;;  %v1386_v61 = vadd.f32 %v368_v50, %v1319_v56 }
 0x1fe   :  { %v1383_v60 = vadd.f32 %v379_v53, %v1316_v55 }
 0x1ff   :  { %v1389_v62 = vadd.f32 %v371_v59, %v1322_v57 }
 0x200   :  { %v447_v2 = vpack.c.bf16 %v1383_v60, %v1392_v63 }
 0x201   :  { %v1025_v0 = vpop.f32.mrb[4].mxu1  ;;  %v446_v1 = vpack.c.bf16 %v1389_v62, %v1386_v61 }
 0x202   :  { %v383_v3 = vpop.f32.mrb[5].mxu1  ;;  %v392_v9 = vadd.f32 %v1025_v0, %v878_v47 }
 0x203   :  { %v384_v4 = vadd.f32 %v878_v47, %v383_v3  ;;  %v1026_v55 = vpop.f32.mrb[6].mxu1  ;;  %1051 = vmatprep.mubr.bf16.mxu0 %v446_v1 }
 0x204   :  { %v395_v56 = vadd.f32 %v1026_v55, %v878_v47  ;;  %v386_v10 = vpop.f32.mrb[7].mxu1  ;;  %1052 = vmatmul.mubr.bf16.vlgmr.msra.gmra.mrb[16].mxu0 %v447_v2  ;;  %v1408_v13 = vadd.f32 %v392_v9, %v1341_v8 }
 0x205   :  { %v387_v57 = vadd.f32 %v878_v47, %v386_v10  ;;  %v1402_v58 = vadd.f32 %v384_v4, %v1335_v6 }
 0x206   :  { %v1399_v11 = vadd.f32 %v395_v56, %v1332_v5 }
 0x207   :  { %v1405_v12 = vadd.f32 %v387_v57, %v1338_v7 }
 0x208   :  { %v449_v17 = vpack.c.bf16 %v1399_v11, %v1408_v13 }
 0x209   :  { %v1029_v14 = vpop.f32.mrb[8].mxu1  ;;  %v448_v15 = vpack.c.bf16 %v1405_v12, %v1402_v58 }
 0x20a   :  { %v399_v16 = vpop.f32.mrb[9].mxu1  ;;  %v408_v23 = vadd.f32 %v1029_v14, %v878_v47 }
 0x20b   :  { %v400_v18 = vadd.f32 %v878_v47, %v399_v16  ;;  %v1030_v5 = vpop.f32.mrb[10].mxu1  ;;  %1055 = vmatprep.mubr.bf16.mxu0 %v448_v15 }
 0x20c   :  { %v411_v6 = vadd.f32 %v1030_v5, %v878_v47  ;;  %v402_v24 = vpop.f32.mrb[11].mxu1  ;;  %1056 = vmatmul.mubr.bf16.gmra.mrb[20].mxu0 %v449_v17  ;;  %v1424_v33 = vadd.f32 %v408_v23, %v1357_v22 }
 0x20d   :  { %v403_v7 = vadd.f32 %v878_v47, %v402_v24  ;;  %v1418_v8 = vadd.f32 %v400_v18, %v1351_v20 }
 0x20e   :  { %v1415_v27 = vadd.f32 %v411_v6, %v1348_v19 }
 0x20f   :  { %v1421_v28 = vadd.f32 %v403_v7, %v1354_v21 }
 0x210   :  { %v451_v37 = vpack.c.bf16 %v1415_v27, %v1424_v33 }
 0x211   :  { %v1033_v30 = vpop.f32.mrb[12].mxu1  ;;  %v450_v34 = vpack.c.bf16 %v1421_v28, %v1418_v8 }
 0x212   :  { %v415_v25 = vpop.f32.mrb[13].mxu1  ;;  %v424_v41 = vadd.f32 %v1033_v30, %v878_v47 }
 0x213   :  { %v416_v26 = vadd.f32 %v878_v47, %v415_v25  ;;  %v1034_v19 = vpop.f32.mrb[14].mxu1  ;;  %1059 = vmatprep.mubr.bf16.mxu0 %v450_v34 }
 0x214   :  { %v427_v20 = vadd.f32 %v1034_v19, %v878_v47  ;;  %v418_v42 = vpop.f32.mrb[15].mxu1  ;;  %1060 = vmatmul.mubr.bf16.gmra.mrb[24].mxu0 %v451_v37  ;;  %v1440_v31 = vadd.f32 %v424_v41, %v1373_v40 }
 0x215   :  { %v419_v21 = vadd.f32 %v878_v47, %v418_v42  ;;  %v1434_v22 = vadd.f32 %v416_v26, %v1367_v29  ;;  %v888_v29 = vld [vmem:[%s1533_s2 + $0x2] ss:$0 sm:$0xff] }
 0x216   :  { %v1431_v43 = vadd.f32 %v427_v20, %v1364_v38  ;;  %v1137_v38 = vld [vmem:[#allocation5 + $0xf8] sm:$0xff]  }
 0x217   :  { %v1437_v36 = vadd.f32 %v419_v21, %v1370_v39  ;;  %1081 = vmatprep.subr.bf16.mxu1 %v1137_v38 }
 0x218   :  { %v453_v35 = vpack.c.bf16 %v1431_v43, %v1440_v31  ;;  %1082 = vmatpush3.bf16.msra.mxu1 %v1137_v38 }
 0x219   :  { %v452_v32 = vpack.c.bf16 %v1437_v36, %v1434_v22 }
 0x21b   :  { %1063 = vmatprep.mubr.bf16.mxu0 %v452_v32 }
 0x21c   :  { %1064 = vmatmul.mubr.bf16.gmra.mrb[28].mxu0 %v453_v35 }
 0x2d7   :  { %v1053_v39 = vpop.f32.mrb[16].mxu0 }
 0x2d8   :  { %v561_v40 = vpop.f32.mrb[17].mxu0  ;;  %v570_v47 = vadd.f32 %v1053_v39, %v888_v29 }
 0x2d9   :  { %v562_v45 = vadd.f32 %v888_v29, %v561_v40  ;;  %v1054_v46 = vpop.f32.mrb[18].mxu0 }
 0x2da   :  { %v573_v48 = vadd.f32 %v1054_v46, %v888_v29  ;;  %v564_v49 = vpop.f32.mrb[19].mxu0  ;;  %v626_v54 = vadd.f32 %v570_v47, %v1392_v63 }
 0x2db   :  { %v565_v50 = vadd.f32 %v888_v29, %v564_v49  ;;  %v1453_v52 = vadd.f32 %v562_v45, %v1386_v61 }
 0x2dc   :  { %v1450_v51 = vadd.f32 %v573_v48, %v1383_v60 }
 0x2dd   :  { %v1456_v53 = vadd.f32 %v565_v50, %v1389_v62 }
 0x2de   :  { %v641_v1 = vpack.c.bf16 %v1450_v51, %v626_v54 }
 0x2df   :  { %v1057_v59 = vpop.f32.mrb[20].mxu0  ;;  %v640_v0 = vpack.c.bf16 %v1456_v53, %v1453_v52 }
 0x2e0   :  { %v577_v2 = vpop.f32.mrb[21].mxu0  ;;  %v586_v60 = vadd.f32 %v1057_v59, %v888_v29 }
 0x2e1   :  { %v578_v3 = vadd.f32 %v888_v29, %v577_v2  ;;  %v1058_v4 = vpop.f32.mrb[22].mxu0  ;;  %1083 = vmatprep.mubr.bf16.mxu1 %v640_v0 }
 0x2e2   :  { %v589_v55 = vadd.f32 %v1058_v4, %v888_v29  ;;  %v580_v9 = vpop.f32.mrb[23].mxu0  ;;  %1084 = vmatmul.mubr.bf16.vlgmr.msra.gmra.mrb[16].mxu1 %v641_v1  ;;  %v630_v10 = vadd.f32 %v586_v60, %v1408_v13 }
 0x2e3   :  { %v581_v61 = vadd.f32 %v888_v29, %v580_v9  ;;  %v1466_v63 = vadd.f32 %v578_v3, %v1402_v58 }
 0x2e4   :  { %v1463_v62 = vadd.f32 %v589_v55, %v1399_v11 }
 0x2e5   :  { %v1469_v56 = vadd.f32 %v581_v61, %v1405_v12 }
 0x2e6   :  { %v643_v16 = vpack.c.bf16 %v1463_v62, %v630_v10 }
 0x2e7   :  { %v1061_v57 = vpop.f32.mrb[24].mxu0  ;;  %v642_v14 = vpack.c.bf16 %v1469_v56, %v1466_v63 }
 0x2e8   :  { %v593_v15 = vpop.f32.mrb[25].mxu0  ;;  %v602_v11 = vadd.f32 %v1061_v57, %v888_v29 }
 0x2e9   :  { %v594_v17 = vadd.f32 %v888_v29, %v593_v15  ;;  %v1062_v18 = vpop.f32.mrb[26].mxu0  ;;  %1087 = vmatprep.mubr.bf16.mxu1 %v642_v14 }
 0x2ea   :  { %v605_v5 = vadd.f32 %v1062_v18, %v888_v29  ;;  %v596_v23 = vpop.f32.mrb[27].mxu0  ;;  %1088 = vmatmul.mubr.bf16.gmra.mrb[20].mxu1 %v643_v16  ;;  %v634_v24 = vadd.f32 %v602_v11, %v1424_v33 }
 0x2eb   :  { %v597_v58 = vadd.f32 %v888_v29, %v596_v23  ;;  %v1479_v13 = vadd.f32 %v594_v17, %v1418_v8 }
 0x2ec   :  { %v1476_v12 = vadd.f32 %v605_v5, %v1415_v27 }
 0x2ed   :  { %v1482_v6 = vadd.f32 %v597_v58, %v1421_v28 }
 0x2ee   :  { %v645_v25 = vpack.c.bf16 %v1476_v12, %v634_v24 }
 0x2ef   :  { %v1065_v7 = vpop.f32.mrb[28].mxu0  ;;  %v644_v30 = vpack.c.bf16 %v1482_v6, %v1479_v13 }
 0x2f0   :  { %v609_v34 = vpop.f32.mrb[29].mxu0  ;;  %v618_v27 = vadd.f32 %v1065_v7, %v888_v29 }
 0x2f1   :  { %v610_v37 = vadd.f32 %v888_v29, %v609_v34  ;;  %v1066_v26 = vpop.f32.mrb[30].mxu0  ;;  %1091 = vmatprep.mubr.bf16.mxu1 %v644_v30 }
 0x2f2   :  { %v621_v19 = vadd.f32 %v1066_v26, %v888_v29  ;;  %v612_v41 = vpop.f32.mrb[31].mxu0  ;;  %1092 = vmatmul.mubr.bf16.gmra.mrb[24].mxu1 %v645_v25  ;;  %v638_v42 = vadd.f32 %v618_v27, %v1440_v31 }
 0x2f3   :  { %v613_v8 = vadd.f32 %v888_v29, %v612_v41  ;;  %v1492_v33 = vadd.f32 %v610_v37, %v1434_v22 }
 0x2f4   :  { %v1489_v28 = vadd.f32 %v621_v19, %v1431_v43  ;;  %v898_v43 = vld [vmem:[%s1533_s2 + $0x3] ss:$0 sm:$0xff]  ;;  %s1216_s2 = smov [#allocation7]  }
 0x2f5   :  { %v1495_v20 = vadd.f32 %v613_v8, %v1437_v36  ;;  %s855_s19 = sshll.u32 %s1216_s2, 4  ;;  %s856_s19 = int_to_ptr.vmem [resolvable:$true] %s855_s19 }
 0x2f6   :  { %v647_v32 = vpack.c.bf16 %v1489_v28, %v638_v42  ;;  %s1182_s20 = scalar_lea.vmem %s856_s19, 2048  ;;  %p1187_p3 = scmp.lt.s32.totalorder %s856_s19, %s856_s19 }
 0x2f7   :  { %v646_v21 = vpack.c.bf16 %v1495_v20, %v1492_v33  ;;  %p1183_p2 = scmp.ne.s32.totalorder %s856_s19, %s1182_s20  ;;  %p1188_p4 = scmp.lt.s32.totalorder %s1182_s20, %s1182_s20 }
 0x2f9   :  { %1095 = vmatprep.mubr.bf16.mxu1 %v646_v21  ;;  %p1189_p5 = por %p1188_p4, %p1187_p3 }
 0x2fa   :  { %1096 = vmatmul.mubr.bf16.gmra.mrb[28].mxu1 %v647_v32 }
 0x2fb   :  { %p1190_p6 = pnand %p1189_p5, %p1183_p2 }
 0x3b5   :  { %v1085_v35 = vpop.f32.mrb[16].mxu1 }
 0x3b6   :  { %v764_v44 = vadd.f32 %v1085_v35, %v898_v43  ;;  %v755_v22 = vpop.f32.mrb[17].mxu1 }
 0x3b7   :  { %v756_v38 = vadd.f32 %v898_v43, %v755_v22  ;;  %v1086_v29 = vpop.f32.mrb[18].mxu1 }
 0x3b8   :  { %v820_v36 = vadd.f32 %v764_v44, %v626_v54  ;;  %v767_v39 = vadd.f32 %v1086_v29, %v898_v43  ;;  %v758_v40 = vpop.f32.mrb[19].mxu1 }
 0x3b9   :  { %v818_v31 = vadd.f32 %v756_v38, %v1453_v52  ;;  %v759_v45 = vadd.f32 %v898_v43, %v758_v40 }
 0x3ba   :  { %836 = vst [vmem:[#allocation7 + $0x10] sm:$0xff] %v820_v36  ;;  %v821_v46 = vadd.f32 %v767_v39, %v1450_v51 }
 0x3bb   :  { %834 = vst [vmem:[#allocation7] sm:$0xff] %v818_v31  ;;  %v819_v47 = vadd.f32 %v759_v45, %v1456_v53 }
 0x3bc   :  { %837 = vst [vmem:[#allocation7 + $0x18] sm:$0xff] %v821_v46 }
 0x3bd   :  { %835 = vst [vmem:[#allocation7 + $0x8] sm:$0xff] %v819_v47  ;;  %v1089_v48 = vpop.f32.mrb[20].mxu1 }
 0x3be   :  { %v780_v49 = vadd.f32 %v1089_v48, %v898_v43  ;;  %v771_v50 = vpop.f32.mrb[21].mxu1 }
 0x3bf   :  { %v772_v59 = vadd.f32 %v898_v43, %v771_v50  ;;  %v1090_v0 = vpop.f32.mrb[22].mxu1 }
 0x3c0   :  { %v824_v1 = vadd.f32 %v780_v49, %v630_v10  ;;  %v783_v54 = vadd.f32 %v1090_v0, %v898_v43  ;;  %v774_v2 = vpop.f32.mrb[23].mxu1 }
 0x3c1   :  { %v822_v3 = vadd.f32 %v772_v59, %v1466_v63  ;;  %v775_v52 = vadd.f32 %v898_v43, %v774_v2 }
 0x3c2   :  { %840 = vst [vmem:[#allocation7 + $0x30] sm:$0xff] %v824_v1  ;;  %v825_v4 = vadd.f32 %v783_v54, %v1463_v62 }
 0x3c3   :  { %838 = vst [vmem:[#allocation7 + $0x20] sm:$0xff] %v822_v3  ;;  %v823_v51 = vadd.f32 %v775_v52, %v1469_v56 }
 0x3c4   :  { %841 = vst [vmem:[#allocation7 + $0x38] sm:$0xff] %v825_v4 }
 0x3c5   :  { %839 = vst [vmem:[#allocation7 + $0x28] sm:$0xff] %v823_v51  ;;  %v1093_v53 = vpop.f32.mrb[24].mxu1 }
 0x3c6   :  { %v796_v60 = vadd.f32 %v1093_v53, %v898_v43  ;;  %v787_v55 = vpop.f32.mrb[25].mxu1 }
 0x3c7   :  { %v788_v9 = vadd.f32 %v898_v43, %v787_v55  ;;  %v1094_v61 = vpop.f32.mrb[26].mxu1 }
 0x3c8   :  { %v828_v57 = vadd.f32 %v796_v60, %v634_v24  ;;  %v799_v10 = vadd.f32 %v1094_v61, %v898_v43  ;;  %v790_v14 = vpop.f32.mrb[27].mxu1 }
 0x3c9   :  { %v826_v15 = vadd.f32 %v788_v9, %v1479_v13  ;;  %v791_v63 = vadd.f32 %v898_v43, %v790_v14 }
 0x3ca   :  { %844 = vst [vmem:[#allocation7 + $0x50] sm:$0xff] %v828_v57  ;;  %v829_v16 = vadd.f32 %v799_v10, %v1476_v12 }
 0x3cb   :  { %842 = vst [vmem:[#allocation7 + $0x40] sm:$0xff] %v826_v15  ;;  %v827_v62 = vadd.f32 %v791_v63, %v1482_v6 }
 0x3cc   :  { %845 = vst [vmem:[#allocation7 + $0x58] sm:$0xff] %v829_v16 }
 0x3cd   :  { %843 = vst [vmem:[#allocation7 + $0x48] sm:$0xff] %v827_v62  ;;  %v1097_v56 = vpop.f32.mrb[28].mxu1 }
 0x3ce   :  { %v812_v17 = vadd.f32 %v1097_v56, %v898_v43  ;;  %v803_v18 = vpop.f32.mrb[29].mxu1 }
 0x3cf   :  { %v804_v11 = vadd.f32 %v898_v43, %v803_v18  ;;  %v1098_v5 = vpop.f32.mrb[30].mxu1 }
 0x3d0   :  { %v832_v23 = vadd.f32 %v812_v17, %v638_v42  ;;  %v815_v58 = vadd.f32 %v1098_v5, %v898_v43  ;;  %v806_v24 = vpop.f32.mrb[31].mxu1 }
 0x3d1   :  { %v830_v13 = vadd.f32 %v804_v11, %v1492_v33  ;;  %v807_v7 = vadd.f32 %v898_v43, %v806_v24 }
 0x3d2   :  { %848 = vst [vmem:[#allocation7 + $0x70] sm:$0xff] %v832_v23  ;;  %v833_v12 = vadd.f32 %v815_v58, %v1489_v28 }
 0x3d3   :  { %846 = vst [vmem:[#allocation7 + $0x60] sm:$0xff] %v830_v13  ;;  %v831_v6 = vadd.f32 %v807_v7, %v1495_v20 }
 0x3d4   :  { %849 = vst [vmem:[#allocation7 + $0x78] sm:$0xff] %v833_v12 }
 0x3d5   :  { %847 = vst [vmem:[#allocation7 + $0x68] sm:$0xff] %v831_v6 }
 0x3d6   :  { %1193 = shalt.err (!%p1190_p6)
}
 0x3d7   :  { %s1194_s25 = scalar_lea.hbm %s1534_s3, 2048 }
 0x3d8   :  { %p1195_p7 = scmp.ne.s32.totalorder %s1534_s3, %s1194_s25  ;;  %p1198_p8 = scmp.lt.u32.totalorder %s1194_s25, %s1534_s3 }
 0x3da   :  { %p1200_p9 = pnand %p1198_p8, %p1195_p7 }
 0x3dc   :  { %1203 = shalt.err (!%p1200_p9)
}
 0x3dd   :  { %861 = dma.vmem_to_hbm [thread:$0]  %s856_s19, 2048, %s1534_s3, [#allocation4], %s1211_s22, %s1211_s22, %s1212_s23  }
 0x3de   :  { %1208 = dma.done.wait [#allocation4], 2048  }
 0x3df   :  { %1209 = vsyncadd [#allocation4], 4294965248 }
 0x3e0   :  { %865 = vsyncpa [#allocation3], 1 }
 0x3e1   :  { %866 = vsyncpa [#allocation6], 1 }
 0x3e2   :  { %867 = vsyncpa [#allocation4], 1 }

</bundles_post_ra>
